<compile_context>
chip_gen: v7x
topology: tpu7x:2x2x1
jax: 0.10.0
libtpu: 0.0.40
codegen_flags: <defaults>
</compile_context>

<pallas_src>
import jax
import jax.numpy as jnp
from jax.experimental import pallas as pl
from jax.experimental.pallas import tpu as pltpu

BN_EPS = 1e-5


# ----------------------------------------------------------------------------
# Fused SE kernel: one batch sample (C, H*W) per grid step.
# ----------------------------------------------------------------------------
def _se_kernel(x_ref, w1_ref, b1_ref, w2_ref, b2_ref, o_ref):
    # x_ref: (C, HW) -- channels on sublanes, spatial on lanes.
    hw = x_ref.shape[-1]
    inv_hw = 1.0 / hw

    # AdaptiveAvgPool2d(1): per-channel spatial mean = lane-axis reduce (XLU).
    pooled = (jnp.sum(x_ref[...], axis=-1, keepdims=True)
              * inv_hw).astype(jnp.float32)                       # (C, 1)

    # fc1 (1x1 conv, BN1 scale folded into w1) + shift + ReLU, on the VPU:
    #   h[m] = relu( sum_c w1[c, m] * pooled[c] + b1[m] )
    # (C,1) pooled lane-broadcasts over the Cm weight columns; sublane reduce.
    h = jnp.sum(w1_ref[...] * pooled, axis=0, keepdims=True) + b1_ref[...]
    h = jnp.maximum(h, 0.0)                                       # (1, Cm)

    # fc2 (1x1 conv, BN2 scale folded into w2) + shift, on the VPU:
    #   z[c] = sum_m w2[c, m] * h[m] + b2[c]
    # (1,Cm) hidden sublane-broadcasts over the C weight rows; lane reduce.
    z = jnp.sum(w2_ref[...] * h, axis=-1, keepdims=True) + b2_ref[...]  # (C, 1)

    # Sigmoid: exp and approximate reciprocal both go to the EUP slot.
    gate = pl.reciprocal(1.0 + jnp.exp(-z), approx=True)          # (C, 1)

    # Gate the input: re-read x from VMEM (don't keep the whole tile live
    # across the squeeze path); the (C,1) gate broadcasts across spatial lanes.
    o_ref[...] = x_ref[...] * gate.astype(o_ref.dtype)


def se_module_forward(x_nchw, params):
    """SEModule.forward (eval mode) on an NCHW input, via one Pallas kernel."""
    n, c, h, w = x_nchw.shape
    hw = h * w
    cm = params["w1"].shape[1]

    # Free metadata reshape (contiguous): NCHW -> (N, C, H*W).  No transposes.
    x = x_nchw.reshape(n, c, hw)

    out = pl.pallas_call(
        _se_kernel,
        out_shape=jax.ShapeDtypeStruct((n, c, hw), x.dtype),
        grid=(n,),
        in_specs=[
            # batch dim squeezed; (C, HW) block == full per-sample dims.
            pl.BlockSpec((None, c, hw), lambda b: (b, 0, 0)),
            pl.BlockSpec((c, cm), lambda b: (0, 0)),   # w1 (BN1 scale folded)
            pl.BlockSpec((1, cm), lambda b: (0, 0)),   # BN1 shift (row)
            pl.BlockSpec((c, cm), lambda b: (0, 0)),   # w2 (BN2 scale folded)
            pl.BlockSpec((c, 1), lambda b: (0, 0)),    # BN2 shift (column)
        ],
        out_specs=pl.BlockSpec((None, c, hw), lambda b: (b, 0, 0)),
        compiler_params=pltpu.CompilerParams(
            dimension_semantics=("parallel",)),        # batch across TCs (v7x)
    )(x, params["w1"], params["b1"], params["w2"], params["b2"])

    # Free metadata reshape back to NCHW.
    return out.reshape(n, c, h, w)


# ----------------------------------------------------------------------------
# Deterministic synthetic parameters (raw PyTorch-style + BN-folded kernel form)
# ----------------------------------------------------------------------------
def make_params(key, channels, reduction):
    cm = channels // reduction
    ks = jax.random.split(key, 10)

    # fc1 weight stored input-major:  w1[c_in, c_mid]  (PyTorch: (c_mid, c_in, 1, 1))
    # fc2 weight stored output-major: w2[c_out, c_mid] (PyTorch: (c_out, c_mid, 1, 1))
    w1 = 0.1 * jax.random.normal(ks[0], (channels, cm), jnp.float32)
    w2 = 0.1 * jax.random.normal(ks[1], (channels, cm), jnp.float32)

    # eval-mode BatchNorm parameters / running stats.
    g1 = 1.0 + 0.05 * jax.random.normal(ks[2], (cm,), jnp.float32)
    be1 = 0.05 * jax.random.normal(ks[3], (cm,), jnp.float32)
    mu1 = 0.05 * jax.random.normal(ks[4], (cm,), jnp.float32)
    v1 = 1.0 + 0.05 * jnp.abs(jax.random.normal(ks[5], (cm,), jnp.float32))

    g2 = 1.0 + 0.05 * jax.random.normal(ks[6], (channels,), jnp.float32)
    be2 = 0.05 * jax.random.normal(ks[7], (channels,), jnp.float32)
    mu2 = 0.05 * jax.random.normal(ks[8], (channels,), jnp.float32)
    v2 = 1.0 + 0.05 * jnp.abs(jax.random.normal(ks[9], (channels,), jnp.float32))

    raw = dict(w1=w1, w2=w2, g1=g1, be1=be1, mu1=mu1, v1=v1,
               g2=g2, be2=be2, mu2=mu2, v2=v2)

    # Fold BN scale into the conv weights (per output channel); keep the shift.
    s1 = g1 / jnp.sqrt(v1 + BN_EPS)            # per mid channel (Cm,)
    s2 = g2 / jnp.sqrt(v2 + BN_EPS)            # per out channel (C,)
    folded = dict(
        w1=w1 * s1[None, :],                   # (C, Cm)
        b1=(be1 - mu1 * s1).reshape(1, cm),    # (1, Cm) row
        w2=w2 * s2[:, None],                   # (C, Cm)
        b2=(be2 - mu2 * s2).reshape(channels, 1),  # (C, 1) column
    )
    return raw, folded


# ----------------------------------------------------------------------------
# Pure-JAX reference (mirrors the PyTorch eval forward)
# ----------------------------------------------------------------------------
def se_reference(x_nchw, raw):
    pooled = jnp.mean(x_nchw, axis=(2, 3))                       # (N, C)
    h = jnp.dot(pooled, raw["w1"], precision=jax.lax.Precision.HIGHEST)
    h = (h - raw["mu1"]) / jnp.sqrt(raw["v1"] + BN_EPS) * raw["g1"] + raw["be1"]
    h = jnp.maximum(h, 0.0)
    g = jnp.dot(h, raw["w2"].T, precision=jax.lax.Precision.HIGHEST)
    g = (g - raw["mu2"]) / jnp.sqrt(raw["v2"] + BN_EPS) * raw["g2"] + raw["be2"]
    g = jax.nn.sigmoid(g)
    return x_nchw * g[:, :, None, None]


if __name__ == "__main__":
    key = jax.random.PRNGKey(0)
    kx, kp = jax.random.split(key)

    channels, reduction = 128, 8     # C=128 sublanes, H*W=256 lanes (lane-dense)
    x = jax.random.normal(kx, (2, channels, 16, 16), jnp.float32)
    raw, folded = make_params(kp, channels, reduction)

    fwd = jax.jit(se_module_forward)
    out = jax.block_until_ready(fwd(x, folded))

    ref = se_reference(x, raw)
    assert out.shape == x.shape, out.shape
    assert bool(jnp.all(jnp.isfinite(out)))
    err = float(jnp.max(jnp.abs(out - ref)))
    assert err < 1e-2, err
    # TODO(synk): train-mode BatchNorm (batch-stat update) has no eval-kernel
    # equivalent here; BN is folded with running stats (eval semantics).
    print("KERNEL_OK")
</pallas_src>

<mosaic_0001>
module attributes {stable_mosaic.version = 11 : i64} {
  func.func @_se_kernel(%arg0: i32, %arg1: memref<1x128x256xf32, #tpu.memory_space<vmem>>, %arg2: memref<128x16xf32, #tpu.memory_space<vmem>>, %arg3: memref<1x16xf32, #tpu.memory_space<vmem>>, %arg4: memref<128x16xf32, #tpu.memory_space<vmem>>, %arg5: memref<128x1xf32, #tpu.memory_space<vmem>>, %arg6: memref<1x128x256xf32, #tpu.memory_space<vmem>>) attributes {dimension_semantics = [#tpu.dimension_semantics<parallel>], iteration_bounds = array<i64: 2>, scalar_prefetch = 0 : i64, scratch_operands = 0 : i64, tpu.core_type = #tpu.core_type<tc>, window_params = [{transform_indices = @transform_0, window_bounds = array<i64: 1, 128, 256>}, {pipeline_mode = #tpu.pipeline_mode<synchronous>, transform_indices = @transform_1, window_bounds = array<i64: 128, 16>}, {pipeline_mode = #tpu.pipeline_mode<synchronous>, transform_indices = @transform_2, window_bounds = array<i64: 1, 16>}, {pipeline_mode = #tpu.pipeline_mode<synchronous>, transform_indices = @transform_3, window_bounds = array<i64: 128, 16>}, {pipeline_mode = #tpu.pipeline_mode<synchronous>, transform_indices = @transform_4, window_bounds = array<i64: 128, 1>}, {transform_indices = @transform_5, window_bounds = array<i64: 1, 128, 256>}]} {
    %c0 = arith.constant 0 : index
    %c0_0 = arith.constant 0 : index
    %c0_1 = arith.constant 0 : index
    %0 = vector.load %arg1[%c0, %c0_0, %c0_1] : memref<1x128x256xf32, #tpu.memory_space<vmem>>, vector<1x128x256xf32>
    %1 = vector.shape_cast %0 : vector<1x128x256xf32> to vector<128x256xf32>
    %cst = arith.constant dense<0.000000e+00> : vector<128xf32>
    %2 = vector.multi_reduction <add>, %1, %cst [1] : vector<128x256xf32> to vector<128xf32>
    %3 = vector.shape_cast %2 : vector<128xf32> to vector<128x1xf32>
    %cst_2 = arith.constant 3.906250e-03 : f32
    %4 = vector.broadcast %cst_2 : f32 to vector<128x1xf32>
    %5 = arith.mulf %3, %4 : vector<128x1xf32>
    %c0_3 = arith.constant 0 : index
    %c0_4 = arith.constant 0 : index
    %6 = vector.load %arg2[%c0_3, %c0_4] : memref<128x16xf32, #tpu.memory_space<vmem>>, vector<128x16xf32>
    %7 = vector.broadcast %5 : vector<128x1xf32> to vector<128x16xf32>
    %8 = arith.mulf %6, %7 : vector<128x16xf32>
    %cst_5 = arith.constant dense<0.000000e+00> : vector<16xf32>
    %9 = vector.multi_reduction <add>, %8, %cst_5 [0] : vector<128x16xf32> to vector<16xf32>
    %10 = vector.shape_cast %9 : vector<16xf32> to vector<1x16xf32>
    %c0_6 = arith.constant 0 : index
    %c0_7 = arith.constant 0 : index
    %11 = vector.load %arg3[%c0_6, %c0_7] : memref<1x16xf32, #tpu.memory_space<vmem>>, vector<1x16xf32>
    %12 = arith.addf %10, %11 : vector<1x16xf32>
    %cst_8 = arith.constant 0.000000e+00 : f32
    %13 = vector.broadcast %cst_8 : f32 to vector<1x16xf32>
    %14 = arith.maximumf %12, %13 : vector<1x16xf32>
    %c0_9 = arith.constant 0 : index
    %c0_10 = arith.constant 0 : index
    %15 = vector.load %arg4[%c0_9, %c0_10] : memref<128x16xf32, #tpu.memory_space<vmem>>, vector<128x16xf32>
    %16 = vector.broadcast %14 : vector<1x16xf32> to vector<128x16xf32>
    %17 = arith.mulf %15, %16 : vector<128x16xf32>
    %cst_11 = arith.constant dense<0.000000e+00> : vector<128xf32>
    %18 = vector.multi_reduction <add>, %17, %cst_11 [1] : vector<128x16xf32> to vector<128xf32>
    %19 = vector.shape_cast %18 : vector<128xf32> to vector<128x1xf32>
    %c0_12 = arith.constant 0 : index
    %c0_13 = arith.constant 0 : index
    %20 = vector.load %arg5[%c0_12, %c0_13] : memref<128x1xf32, #tpu.memory_space<vmem>>, vector<128x1xf32>
    %21 = arith.addf %19, %20 : vector<128x1xf32>
    %cst_14 = arith.constant 0.000000e+00 : f32
    %22 = vector.broadcast %cst_14 : f32 to vector<128x1xf32>
    %23 = arith.subf %22, %21 : vector<128x1xf32>
    %24 = math.exp %23 : vector<128x1xf32>
    %cst_15 = arith.constant 1.000000e+00 : f32
    %25 = vector.broadcast %cst_15 : f32 to vector<128x1xf32>
    %26 = arith.addf %25, %24 : vector<128x1xf32>
    %27 = tpu.reciprocal %26 {approx = true} : vector<128x1xf32> -> vector<128x1xf32>
    %c0_16 = arith.constant 0 : index
    %c0_17 = arith.constant 0 : index
    %c0_18 = arith.constant 0 : index
    %28 = vector.load %arg1[%c0_16, %c0_17, %c0_18] : memref<1x128x256xf32, #tpu.memory_space<vmem>>, vector<1x128x256xf32>
    %29 = vector.shape_cast %28 : vector<1x128x256xf32> to vector<128x256xf32>
    %30 = vector.broadcast %27 : vector<128x1xf32> to vector<128x256xf32>
    %31 = arith.mulf %29, %30 : vector<128x256xf32>
    %c0_19 = arith.constant 0 : index
    %c0_20 = arith.constant 0 : index
    %c0_21 = arith.constant 0 : index
    %32 = vector.load %arg6[%c0_19, %c0_20, %c0_21] : memref<1x128x256xf32, #tpu.memory_space<vmem>>, vector<1x128x256xf32>
    %33 = vector.shape_cast %32 : vector<1x128x256xf32> to vector<128x256xf32>
    %34 = vector.shape_cast %31 : vector<128x256xf32> to vector<1x128x256xf32>
    tpu.vector_store %arg6[%c0_19, %c0_20, %c0_21], %34 {strides = array<i32>} : memref<1x128x256xf32, #tpu.memory_space<vmem>>, vector<1x128x256xf32>,
    return
  }
  func.func @transform_0(%arg0: i32) -> (i32, i32, i32) {
    %c0_i32 = arith.constant 0 : i32
    %c0_i32_0 = arith.constant 0 : i32
    %c0_i32_1 = arith.constant 0 : i32
    return %arg0, %c0_i32, %c0_i32_0 : i32, i32, i32
  }
  func.func @transform_1(%arg0: i32) -> (i32, i32) {
    %c0_i32 = arith.constant 0 : i32
    %c0_i32_0 = arith.constant 0 : i32
    %c0_i32_1 = arith.constant 0 : i32
    return %c0_i32, %c0_i32_0 : i32, i32
  }
  func.func @transform_2(%arg0: i32) -> (i32, i32) {
    %c0_i32 = arith.constant 0 : i32
    %c0_i32_0 = arith.constant 0 : i32
    %c0_i32_1 = arith.constant 0 : i32
    return %c0_i32, %c0_i32_0 : i32, i32
  }
  func.func @transform_3(%arg0: i32) -> (i32, i32) {
    %c0_i32 = arith.constant 0 : i32
    %c0_i32_0 = arith.constant 0 : i32
    %c0_i32_1 = arith.constant 0 : i32
    return %c0_i32, %c0_i32_0 : i32, i32
  }
  func.func @transform_4(%arg0: i32) -> (i32, i32) {
    %c0_i32 = arith.constant 0 : i32
    %c0_i32_0 = arith.constant 0 : i32
    %c0_i32_1 = arith.constant 0 : i32
    return %c0_i32, %c0_i32_0 : i32, i32
  }
  func.func @transform_5(%arg0: i32) -> (i32, i32, i32) {
    %c0_i32 = arith.constant 0 : i32
    %c0_i32_0 = arith.constant 0 : i32
    %c0_i32_1 = arith.constant 0 : i32
    return %arg0, %c0_i32, %c0_i32_0 : i32, i32, i32
  }
}

</mosaic_0001>

<bundles_post_ra>
// kernel: se_module_forward.1
= control target key start
LH: loop header
LB: loop body
LE: loop exit
PB: predicated region body
PF: predicated region fallthrough
CT: control target
= control target key end

     0   :  { %s916_s18 = smov 0   ;;  %s1315_s0 = inlined_call_operand.vmem [shape: f32[2,128,256], index: 0, kind: input, shape index: {}]   ;;  %s1316_s1 = inlined_call_operand.vmem [shape: f32[128,16], index: 1, kind: input, shape index: {}]   ;;  %s1317_s2 = inlined_call_operand.vmem [shape: f32[1,16], index: 2, kind: input, shape index: {}]   ;;  %s1318_s3 = inlined_call_operand.vmem [shape: f32[128,16], index: 3, kind: input, shape index: {}]   ;;  %s1319_s4 = inlined_call_operand.vmem [shape: f32[128,1], index: 4, kind: input, shape index: {}]   ;;  %s1320_s5 = inlined_call_operand.vmem [shape: f32[2,128,256], index: 5, kind: output, shape index: {}]  }
   0x1 LB: > { %s789_s19 = sadd.s32 4294967295, %s883_s18   ;;  %p793_p0 = scmp.ge.s32.totalorder %s883_s18, 1  ;;  %s883_s18 = sphi %s916_s18, %s15_s18  }
   0x2   : > { %p187_p1 = scmp.lt.s32.totalorder %s883_s18, 3 }
   0x4   : > { %p188_p2 = pnand %p793_p0, %p187_p1 }
   0x5   : > { %p215_p3 = scmp.lt.s32.totalorder (!%p188_p2), %s789_s19, 1  ;;  %v321_v51 = vld [vmem:[%s1316_s1] sm:$0xff] (!%p188_p2)  ;;  %v323_v53 = vld [vmem:[%s1316_s1 + $0x10] sm:$0xff] (!%p188_p2)  ;;  %v322_v54 = vld [vmem:[%s1316_s1 + $0x8] sm:$0xff] (!%p188_p2)  ;;  %vm353_vm0 = vcmask (!%p188_p2), 130048  }
   0x6   : > { %191 = sbr.rel (%p188_p2) target bundleno = 565 (0x235), region = 40  ;;  %v324_v58 = vld [vmem:[%s1316_s1 + $0x18] sm:$0xff] (!%p188_p2) }
   0xd   : > { %s1322_s19 = smov (!%p215_p3, %s789_s19), 1 }
   0xe   : > { %s800_s20 = sshll.u32 %s1322_s19, 8 }
   0xf   : > { %s932_s23 = scalar_lea.vmem %s1315_s0, %s800_s20  ;;  %s1246_s11 = scalar_lea.vmem %s1320_s5, %s800_s20 }
  0x10   : > { %v935_v0 = vld [vmem:[%s932_s23] sm:$0xff]  ;;  %v938_v1 = vld [vmem:[%s932_s23 + $0x8] sm:$0xff]  ;;  %v949_v5 = vld [vmem:[%s932_s23 + $0x10] sm:$0xff] }
  0x11   : > { %v941_v2 = vld [vmem:[%s932_s23 + $0x20] sm:$0xff]  ;;  %v257_v3 = vadd.f32 %v938_v1, %v935_v0  ;;  %v946_v4 = vld [vmem:[%s932_s23 + $0x28] sm:$0xff]  ;;  %v952_v6 = vld [vmem:[%s932_s23 + $0x18] sm:$0xff] }
  0x12   : > { %v263_v7 = vadd.f32 %v946_v4, %v941_v2  ;;  %v957_v8 = vld [vmem:[%s932_s23 + $0x30] sm:$0xff]  ;;  %v960_v9 = vld [vmem:[%s932_s23 + $0x38] sm:$0xff]  ;;  %v260_v10 = vadd.f32 %v952_v6, %v949_v5  ;;  %v967_v12 = vld [vmem:[%s932_s23 + $0x40] sm:$0xff] }
  0x13   : > { %258 = vadd.xlane.f32.xlu0 %v257_v3  ;;  %v266_v11 = vadd.f32 %v960_v9, %v957_v8  ;;  %v970_v13 = vld [vmem:[%s932_s23 + $0x48] sm:$0xff]  ;;  %v973_v14 = vld [vmem:[%s932_s23 + $0x50] sm:$0xff]  ;;  %v976_v15 = vld [vmem:[%s932_s23 + $0x58] sm:$0xff] }
  0x14   : > { %264 = vadd.xlane.f32.xlu1 %v263_v7  ;;  %v269_v16 = vadd.f32 %v970_v13, %v967_v12  ;;  %v272_v17 = vadd.f32 %v976_v15, %v973_v14  ;;  %v983_v18 = vld [vmem:[%s932_s23 + $0x60] sm:$0xff]  ;;  %v986_v19 = vld [vmem:[%s932_s23 + $0x68] sm:$0xff]  ;;  %v989_v20 = vld [vmem:[%s932_s23 + $0x70] sm:$0xff] }
  0x15   : > { %v992_v21 = vld [vmem:[%s932_s23 + $0x78] sm:$0xff]  ;;  %v275_v22 = vadd.f32 %v986_v19, %v983_v18  ;;  %v999_v24 = vld [vmem:[%s932_s23 + $0x80] sm:$0xff]  ;;  %v1002_v25 = vld [vmem:[%s932_s23 + $0x88] sm:$0xff] }
  0x16   : > { %v278_v23 = vadd.f32 %v992_v21, %v989_v20  ;;  %v1005_v26 = vld [vmem:[%s932_s23 + $0x90] sm:$0xff]  ;;  %v1008_v27 = vld [vmem:[%s932_s23 + $0x98] sm:$0xff]  ;;  %v281_v28 = vadd.f32 %v1002_v25, %v999_v24  ;;  %v1015_v30 = vld [vmem:[%s932_s23 + $0xa0] sm:$0xff] }
  0x17   : > { %261 = vadd.xlane.f32.xlu0 %v260_v10  ;;  %v284_v29 = vadd.f32 %v1008_v27, %v1005_v26  ;;  %v1018_v31 = vld [vmem:[%s932_s23 + $0xa8] sm:$0xff]  ;;  %v1021_v32 = vld [vmem:[%s932_s23 + $0xb0] sm:$0xff]  ;;  %v1024_v33 = vld [vmem:[%s932_s23 + $0xb8] sm:$0xff] }
  0x18   : > { %267 = vadd.xlane.f32.xlu1 %v266_v11  ;;  %v287_v34 = vadd.f32 %v1018_v31, %v1015_v30  ;;  %v290_v35 = vadd.f32 %v1024_v33, %v1021_v32  ;;  %v1031_v36 = vld [vmem:[%s932_s23 + $0xc0] sm:$0xff]  ;;  %v1034_v37 = vld [vmem:[%s932_s23 + $0xc8] sm:$0xff]  ;;  %v1037_v38 = vld [vmem:[%s932_s23 + $0xd0] sm:$0xff] }
  0x19   : > { %v1040_v39 = vld [vmem:[%s932_s23 + $0xd8] sm:$0xff]  ;;  %v293_v40 = vadd.f32 %v1034_v37, %v1031_v36  ;;  %v1047_v42 = vld [vmem:[%s932_s23 + $0xe0] sm:$0xff]  ;;  %v1050_v43 = vld [vmem:[%s932_s23 + $0xe8] sm:$0xff] }
  0x1a   : > { %v296_v41 = vadd.f32 %v1040_v39, %v1037_v38  ;;  %v1053_v44 = vld [vmem:[%s932_s23 + $0xf0] sm:$0xff]  ;;  %v1056_v45 = vld [vmem:[%s932_s23 + $0xf8] sm:$0xff]  ;;  %v299_v46 = vadd.f32 %v1050_v43, %v1047_v42  ;;  %v325_v3 = vld [vmem:[%s1316_s1 + $0x20] sm:$0xff] }
  0x1b   : > { %270 = vadd.xlane.f32.xlu0 %v269_v16  ;;  %v302_v47 = vadd.f32 %v1056_v45, %v1053_v44 }
  0x1c   : > { %273 = vadd.xlane.f32.xlu1 %v272_v17  ;;  %v326_v17 = vld [vmem:[%s1316_s1 + $0x28] sm:$0xff] }
  0x1f   : > { %276 = vadd.xlane.f32.xlu0 %v275_v22 }
  0x20   : > { %279 = vadd.xlane.f32.xlu1 %v278_v23 }
  0x23   : > { %282 = vadd.xlane.f32.xlu0 %v281_v28 }
  0x24   : > { %285 = vadd.xlane.f32.xlu1 %v284_v29 }
  0x27   : > { %288 = vadd.xlane.f32.xlu0 %v287_v34 }
  0x28   : > { %291 = vadd.xlane.f32.xlu1 %v290_v35 }
  0x2b   : > { %294 = vadd.xlane.f32.xlu0 %v293_v40 }
  0x2c   : > { %297 = vadd.xlane.f32.xlu1 %v296_v41 }
  0x2f   : > { %300 = vadd.xlane.f32.xlu0 %v299_v46  ;;  %v327_v46 = vld [vmem:[%s1316_s1 + $0x30] sm:$0xff] }
  0x30   : > { %303 = vadd.xlane.f32.xlu1 %v302_v47 }
  0xa0   : > { %v259_v48 = vpop.xlane.xlu0 %258 }
  0xa1   : > { %v305_v49 = vmul.f32 0.00390625, %v259_v48  ;;  %v265_v50 = vpop.xlane.xlu1 %264 }
  0xa2   : > { %v307_v52 = vmul.f32 0.00390625, %v265_v50  ;;  %v328_v50 = vld [vmem:[%s1316_s1 + $0x38] sm:$0xff] }
  0xa3   : > { %v337_v56 = vmul.f32 %v321_v51, %v305_v49 }
  0xa4   : > { %v262_v55 = vpop.xlane.xlu0 %261  ;;  %v339_v61 = vmul.f32 %v323_v53, %v307_v52 }
  0xa5   : > { %v306_v57 = vmul.f32 0.00390625, %v262_v55  ;;  %v268_v59 = vpop.xlane.xlu1 %267  ;;  %v354_v10 = vsel %vm353_vm0, %v337_v56, 0.0 }
  0xa6   : > { %v308_v60 = vmul.f32 0.00390625, %v268_v59  ;;  %v357_v29 = vsel %vm353_vm0, %v339_v61, 0.0 }
  0xa7   : > { %v338_v62 = vmul.f32 %v322_v54, %v306_v57 }
  0xa8   : > { %v340_v63 = vmul.f32 %v324_v58, %v308_v60  ;;  %v271_v7 = vpop.xlane.xlu0 %270  ;;  %v329_v58 = vld [vmem:[%s1316_s1 + $0x40] sm:$0xff] }
  0xa9   : > { %v355_v11 = vsel %vm353_vm0, %v338_v62, 0.0  ;;  %v309_v16 = vmul.f32 0.00390625, %v271_v7  ;;  %v274_v22 = vpop.xlane.xlu1 %273  ;;  %v330_v62 = vld [vmem:[%s1316_s1 + $0x48] sm:$0xff] }
  0xaa   : > { %v356_v23 = vadd.f32 %v355_v11, %v354_v10  ;;  %v310_v28 = vmul.f32 0.00390625, %v274_v22  ;;  %v359_v34 = vsel %vm353_vm0, %v340_v63, 0.0  ;;  %v331_v22 = vld [vmem:[%s1316_s1 + $0x50] sm:$0xff] }
  0xab   : > { %v341_v35 = vmul.f32 %v325_v3, %v309_v16 }
  0xac   : > { %v358_v40 = vadd.f32 %v357_v29, %v356_v23  ;;  %v342_v41 = vmul.f32 %v326_v17, %v310_v28  ;;  %v277_v47 = vpop.xlane.xlu0 %276 }
  0xad   : > { %v361_v48 = vsel %vm353_vm0, %v341_v35, 0.0  ;;  %v311_v49 = vmul.f32 0.00390625, %v277_v47  ;;  %v280_v51 = vpop.xlane.xlu1 %279 }
  0xae   : > { %v360_v52 = vadd.f32 %v359_v34, %v358_v40  ;;  %v312_v53 = vmul.f32 0.00390625, %v280_v51  ;;  %v363_v54 = vsel %vm353_vm0, %v342_v41, 0.0  ;;  %v332_v34 = vld [vmem:[%s1316_s1 + $0x58] sm:$0xff] }
  0xaf   : > { %v343_v55 = vmul.f32 %v327_v46, %v311_v49 }
  0xb0   : > { %v362_v56 = vadd.f32 %v361_v48, %v360_v52  ;;  %v344_v57 = vmul.f32 %v328_v50, %v312_v53  ;;  %v283_v59 = vpop.xlane.xlu0 %282  ;;  %v333_v50 = vld [vmem:[%s1316_s1 + $0x60] sm:$0xff] }
  0xb1   : > { %v365_v60 = vsel %vm353_vm0, %v343_v55, 0.0  ;;  %v313_v61 = vmul.f32 0.00390625, %v283_v59  ;;  %v286_v63 = vpop.xlane.xlu1 %285 }
  0xb2   : > { %v364_v3 = vadd.f32 %v363_v54, %v362_v56  ;;  %v314_v7 = vmul.f32 0.00390625, %v286_v63  ;;  %v367_v10 = vsel %vm353_vm0, %v344_v57, 0.0  ;;  %v334_v54 = vld [vmem:[%s1316_s1 + $0x68] sm:$0xff] }
  0xb3   : > { %v345_v11 = vmul.f32 %v329_v58, %v313_v61 }
  0xb4   : > { %v366_v16 = vadd.f32 %v365_v60, %v364_v3  ;;  %v346_v17 = vmul.f32 %v330_v62, %v314_v7  ;;  %v289_v23 = vpop.xlane.xlu0 %288  ;;  %v335_v62 = vld [vmem:[%s1316_s1 + $0x70] sm:$0xff] }
  0xb5   : > { %v369_v28 = vsel %vm353_vm0, %v345_v11, 0.0  ;;  %v315_v29 = vmul.f32 0.00390625, %v289_v23  ;;  %v292_v35 = vpop.xlane.xlu1 %291 }
  0xb6   : > { %v368_v40 = vadd.f32 %v367_v10, %v366_v16  ;;  %v316_v41 = vmul.f32 0.00390625, %v292_v35  ;;  %v371_v46 = vsel %vm353_vm0, %v346_v17, 0.0  ;;  %v336_v10 = vld [vmem:[%s1316_s1 + $0x78] sm:$0xff] }
  0xb7   : > { %v347_v47 = vmul.f32 %v331_v22, %v315_v29 }
  0xb8   : > { %v370_v48 = vadd.f32 %v369_v28, %v368_v40  ;;  %v348_v49 = vmul.f32 %v332_v34, %v316_v41  ;;  %v295_v51 = vpop.xlane.xlu0 %294 }
  0xb9   : > { %v373_v52 = vsel %vm353_vm0, %v347_v47, 0.0  ;;  %v317_v53 = vmul.f32 0.00390625, %v295_v51  ;;  %v298_v55 = vpop.xlane.xlu1 %297 }
  0xba   : > { %v372_v56 = vadd.f32 %v371_v46, %v370_v48  ;;  %v318_v57 = vmul.f32 0.00390625, %v298_v55  ;;  %v375_v58 = vsel %vm353_vm0, %v348_v49, 0.0  ;;  %v410_v49 = vlaneseq }
  0xbb   : > { %v349_v59 = vmul.f32 %v333_v50, %v317_v53 }
  0xbc   : > { %v374_v60 = vadd.f32 %v373_v52, %v372_v56  ;;  %v350_v61 = vmul.f32 %v334_v54, %v318_v57  ;;  %v301_v63 = vpop.xlane.xlu0 %300  ;;  %v411_v52 = vshrl.u32 %v410_v49, 7  ;;  %v391_v54 = vld [vmem:[%s1317_s2] sm:$0x1] }
  0xbd   : > { %v377_v3 = vsel %vm353_vm0, %v349_v59, 0.0  ;;  %v319_v7 = vmul.f32 0.00390625, %v301_v63  ;;  %v304_v11 = vpop.xlane.xlu1 %303  ;;  %v395_v59 = vld [vmem:[%s1318_s3 + $0x8] sm:$0xff]  ;;  %v396_v63 = vld [vmem:[%s1318_s3 + $0x10] sm:$0xff] }
  0xbe   : > { %v376_v16 = vadd.f32 %v375_v58, %v374_v60  ;;  %v320_v17 = vmul.f32 0.00390625, %v304_v11  ;;  %v379_v22 = vsel %vm353_vm0, %v350_v61, 0.0  ;;  %v412_v56 = vsub.s32 0, %v411_v52  ;;  %v394_v60 = vld [vmem:[%s1318_s3] sm:$0xff] }
  0xbf   : > { %v351_v23 = vmul.f32 %v335_v62, %v319_v7  ;;  %v397_v62 = vld [vmem:[%s1318_s3 + $0x18] sm:$0xff] }
  0xc0   : > { %v378_v28 = vadd.f32 %v377_v3, %v376_v16  ;;  %v352_v29 = vmul.f32 %v336_v10, %v320_v17 }
  0xc1   : > { %v381_v34 = vsel %vm353_vm0, %v351_v23, 0.0  ;;  %v398_v23 = vld [vmem:[%s1318_s3 + $0x20] sm:$0xff] }
  0xc2   : > { %v380_v35 = vadd.f32 %v379_v22, %v378_v28  ;;  %v383_v40 = vsel %vm353_vm0, %v352_v29, 0.0  ;;  %v399_v22 = vld [vmem:[%s1318_s3 + $0x28] sm:$0xff] }
  0xc4   : > { %v382_v41 = vadd.f32 %v381_v34, %v380_v35 }
  0xc6   : > { %v384_v46 = vadd.f32 %v383_v40, %v382_v41  ;;  %v401_v40 = vld [vmem:[%s1318_s3 + $0x38] sm:$0xff]  ;;  %v400_v41 = vld [vmem:[%s1318_s3 + $0x30] sm:$0xff] }
  0xc8   : > { %v385_v47 = vrot.slane %v384_v46, 4 }
  0xca   : > { %v386_v48 = vadd.f32 %v385_v47, %v384_v46 }
  0xcc   : > { %v387_v50 = vrot.slane %v386_v48, 2 }
  0xce   : > { %v388_v51 = vadd.f32 %v387_v50, %v386_v48  ;;  %v403_v50 = vld [vmem:[%s1318_s3 + $0x48] sm:$0xff] }
  0xd0   : > { %v389_v53 = vrot.slane %v388_v51, 1 }
  0xd2   : > { %v390_v55 = vadd.f32 %v389_v53, %v388_v51  ;;  %v402_v51 = vld [vmem:[%s1318_s3 + $0x40] sm:$0xff] }
  0xd4   : > { %v392_v57 = vadd.f32 %v391_v54, %v390_v55 }
  0xd6   : > { %v393_v58 = vmax.f32 %v392_v57, 0.0  ;;  %v404_v57 = vld [vmem:[%s1318_s3 + $0x50] sm:$0xff] }
  0xd8   : > { %v413_v61 = vrot.slane %v393_v58, %v412_v56  ;;  %v405_v56 = vld [vmem:[%s1318_s3 + $0x58] sm:$0xff] }
  0xda   : > { %v415_v3 = vmul.f32 %v413_v61, %v395_v59  ;;  %v414_v7 = vmul.f32 %v413_v61, %v394_v60  ;;  %v417_v16 = vmul.f32 %v413_v61, %v397_v62  ;;  %v416_v17 = vmul.f32 %v413_v61, %v396_v63  ;;  %v407_v63 = vld [vmem:[%s1318_s3 + $0x68] sm:$0xff] }
  0xdb   : > { %v419_v34 = vmul.f32 %v413_v61, %v399_v22  ;;  %v418_v35 = vmul.f32 %v413_v61, %v398_v23  ;;  %v421_v48 = vmul.f32 %v413_v61, %v401_v40  ;;  %v420_v49 = vmul.f32 %v413_v61, %v400_v41  ;;  %v408_v22 = vld [vmem:[%s1318_s3 + $0x70] sm:$0xff] }
  0xdc   : > { %v433_v10 = vsel %vm353_vm0, %v415_v3, 0.0  ;;  %v430_v11 = vsel %vm353_vm0, %v414_v7, 0.0  ;;  %v439_v28 = vsel %vm353_vm0, %v417_v16, 0.0  ;;  %v436_v29 = vsel %vm353_vm0, %v416_v17, 0.0  ;;  %v406_v3 = vld [vmem:[%s1318_s3 + $0x60] sm:$0xff]  ;;  %v409_v17 = vld [vmem:[%s1318_s3 + $0x78] sm:$0xff] }
  0xdd   : > { %434 = vadd.xlane.f32.xlu1 %v433_v10  ;;  %431 = vadd.xlane.f32.xlu0 %v430_v11  ;;  %v445_v46 = vsel %vm353_vm0, %v419_v34, 0.0  ;;  %v442_v47 = vsel %vm353_vm0, %v418_v35, 0.0  ;;  %v451_v52 = vsel %vm353_vm0, %v421_v48, 0.0  ;;  %v448_v53 = vsel %vm353_vm0, %v420_v49, 0.0 }
  0xde   : > { %v423_v54 = vmul.f32 %v413_v61, %v403_v50  ;;  %v422_v55 = vmul.f32 %v413_v61, %v402_v51  ;;  %v425_v60 = vmul.f32 %v413_v61, %v405_v56  ;;  %v424_v62 = vmul.f32 %v413_v61, %v404_v57  ;;  %v481_v51 = vld [vmem:[%s1319_s4 + $0x18] sm:$0xff] }
  0xdf   : > { %v427_v11 = vmul.f32 %v413_v61, %v407_v63  ;;  %v426_v16 = vmul.f32 %v413_v61, %v406_v3  ;;  %v428_v34 = vmul.f32 %v413_v61, %v408_v22  ;;  %v885_v41 = vmov 0   ;;  %v482_v63 = vld [vmem:[%s1319_s4 + $0x20] sm:$0xff] }
  0xe0   : > { %v457_v58 = vsel %vm353_vm0, %v423_v54, 0.0  ;;  %v454_v59 = vsel %vm353_vm0, %v422_v55, 0.0  ;;  %v463_v7 = vsel %vm353_vm0, %v425_v60, 0.0  ;;  %v460_v10 = vsel %vm353_vm0, %v424_v62, 0.0  ;;  %812 = vset.pattern.permute.xlu1 %v885_v41  ;;  %811 = vset.pattern.permute.xlu0 %v885_v41  ;;  %v483_v62 = vld [vmem:[%s1319_s4 + $0x28] sm:$0xff] }
  0xe1   : > { %440 = vadd.xlane.f32.xlu1 %v439_v28  ;;  %437 = vadd.xlane.f32.xlu0 %v436_v29  ;;  %v469_v23 = vsel %vm353_vm0, %v427_v11, 0.0  ;;  %v466_v28 = vsel %vm353_vm0, %v426_v16, 0.0  ;;  %v429_v29 = vmul.f32 %v413_v61, %v409_v17  ;;  %v472_v40 = vsel %vm353_vm0, %v428_v34, 0.0 }
  0xe3   : > { %v475_v35 = vsel %vm353_vm0, %v429_v29, 0.0 }
  0xe5   : > { %446 = vadd.xlane.f32.xlu1 %v445_v46  ;;  %443 = vadd.xlane.f32.xlu0 %v442_v47  ;;  %v479_v46 = vld [vmem:[%s1319_s4 + $0x8] sm:$0xff]  ;;  %v478_v47 = vld [vmem:[%s1319_s4] sm:$0xff] }
  0xe9   : > { %452 = vadd.xlane.f32.xlu1 %v451_v52  ;;  %449 = vadd.xlane.f32.xlu0 %v448_v53  ;;  %v480_v52 = vld [vmem:[%s1319_s4 + $0x10] sm:$0xff] }
  0xed   : > { %458 = vadd.xlane.f32.xlu1 %v457_v58  ;;  %455 = vadd.xlane.f32.xlu0 %v454_v59 }
  0xf1   : > { %464 = vadd.xlane.f32.xlu1 %v463_v7  ;;  %461 = vadd.xlane.f32.xlu0 %v460_v10 }
  0xf5   : > { %470 = vadd.xlane.f32.xlu1 %v469_v23  ;;  %467 = vadd.xlane.f32.xlu0 %v466_v28  ;;  %v484_v28 = vld [vmem:[%s1319_s4 + $0x30] sm:$0xff] }
  0xf9   : > { %476 = vadd.xlane.f32.xlu1 %v475_v35  ;;  %473 = vadd.xlane.f32.xlu0 %v472_v40 }
 0x16a   : > { %v435_v61 = vpop.xlane.xlu1 %434  ;;  %v432_v48 = vpop.xlane.xlu0 %431 }
 0x16b   : > { %v495_v49 = vadd.f32 %v479_v46, %v435_v61  ;;  %v494_v50 = vadd.f32 %v478_v47, %v432_v48  ;;  %v485_v47 = vld [vmem:[%s1319_s4 + $0x38] sm:$0xff]  ;;  %v487_v48 = vld [vmem:[%s1319_s4 + $0x48] sm:$0xff] }
 0x16d   : > { %v511_v53 = vsub.f32 0.0, %v495_v49  ;;  %v510_v54 = vsub.f32 0.0, %v494_v50 }
 0x16e   : > { %v441_v55 = vpop.xlane.xlu1 %440  ;;  %v438_v56 = vpop.xlane.xlu0 %437 }
 0x16f   : > { %v528_v57 = vmul.f32 1.442695, %v511_v53  ;;  %v526_v58 = vmul.f32 1.442695, %v510_v54  ;;  %v497_v59 = vadd.f32 %v481_v51, %v441_v55  ;;  %v496_v60 = vadd.f32 %v480_v52, %v438_v56  ;;  %v486_v55 = vld [vmem:[%s1319_s4 + $0x40] sm:$0xff] }
 0x171   : > { %813 = vpow2.f32 %v528_v57  ;;  %v513_v3 = vsub.f32 0.0, %v497_v59  ;;  %v512_v7 = vsub.f32 0.0, %v496_v60 }
 0x172   : > { %815 = vpow2.f32 %v526_v58  ;;  %v447_v10 = vpop.xlane.xlu1 %446  ;;  %v444_v11 = vpop.xlane.xlu0 %443  ;;  %v489_v58 = vld [vmem:[%s1319_s4 + $0x58] sm:$0xff] }
 0x173   : > { %v532_v16 = vmul.f32 1.442695, %v513_v3  ;;  %v530_v17 = vmul.f32 1.442695, %v512_v7  ;;  %v499_v22 = vadd.f32 %v483_v62, %v447_v10  ;;  %v498_v23 = vadd.f32 %v482_v63, %v444_v11  ;;  %v488_v62 = vld [vmem:[%s1319_s4 + $0x50] sm:$0xff] }
 0x175   : > { %817 = vpow2.f32 %v532_v16  ;;  %v515_v29 = vsub.f32 0.0, %v499_v22  ;;  %v514_v34 = vsub.f32 0.0, %v498_v23 }
 0x176   : > { %819 = vpow2.f32 %v530_v17  ;;  %v453_v35 = vpop.xlane.xlu1 %452  ;;  %v450_v40 = vpop.xlane.xlu0 %449 }
 0x177   : > { %v536_v41 = vmul.f32 1.442695, %v515_v29  ;;  %v534_v46 = vmul.f32 1.442695, %v514_v34  ;;  %v500_v61 = vadd.f32 %v484_v28, %v450_v40  ;;  %v501_v49 = vadd.f32 %v485_v47, %v453_v35  ;;  %v491_v29 = vld [vmem:[%s1319_s4 + $0x68] sm:$0xff]  ;;  %v490_v47 = vld [vmem:[%s1319_s4 + $0x60] sm:$0xff] }
 0x179   : > { %821 = vpow2.f32 %v534_v46  ;;  %v516_v50 = vsub.f32 0.0, %v500_v61  ;;  %v517_v63 = vsub.f32 0.0, %v501_v49 }
 0x17a   : > { %v459_v51 = vpop.xlane.xlu1 %458  ;;  %v456_v52 = vpop.xlane.xlu0 %455  ;;  %823 = vpow2.f32 %v536_v41 }
 0x17b   : > { %v814_v53 = vpop.eup %813  ;;  %v503_v54 = vadd.f32 %v487_v48, %v459_v51  ;;  %v538_v3 = vmul.f32 1.442695, %v516_v50  ;;  %v502_v7 = vadd.f32 %v486_v55, %v456_v52  ;;  %v540_v40 = vmul.f32 1.442695, %v517_v63 }
 0x17c   : > { %v816_v56 = vpop.eup %815  ;;  %v559_v57 = vadd.f32 1.0, %v814_v53  ;;  %v493_v53 = vld [vmem:[%s1319_s4 + $0x78] sm:$0xff] }
 0x17d   : > { %v558_v59 = vadd.f32 1.0, %v816_v56  ;;  %v519_v60 = vsub.f32 0.0, %v503_v54  ;;  %v518_v41 = vsub.f32 0.0, %v502_v7 }
 0x17e   : > { %825 = vrcp.f32 %v559_v57  ;;  %v465_v10 = vpop.xlane.xlu1 %464  ;;  %v462_v11 = vpop.xlane.xlu0 %461 }
 0x17f   : > { %v818_v16 = vpop.eup %817  ;;  %827 = vrcp.f32 %v558_v59  ;;  %v544_v17 = vmul.f32 1.442695, %v519_v60  ;;  %v505_v22 = vadd.f32 %v489_v58, %v465_v10  ;;  %v504_v28 = vadd.f32 %v488_v62, %v462_v11  ;;  %v492_v59 = vld [vmem:[%s1319_s4 + $0x70] sm:$0xff] }
 0x180   : > { %v820_v23 = vpop.eup %819  ;;  %v561_v48 = vadd.f32 1.0, %v818_v16  ;;  %v542_v57 = vmul.f32 1.442695, %v518_v41 }
 0x181   : > { %v560_v34 = vadd.f32 1.0, %v820_v23  ;;  %829 = vpow2.f32 %v544_v17  ;;  %v521_v35 = vsub.f32 0.0, %v505_v22  ;;  %v520_v52 = vsub.f32 0.0, %v504_v28 }
 0x182   : > { %831 = vpow2.f32 %v538_v3  ;;  %v471_v46 = vpop.xlane.xlu1 %470  ;;  %v468_v61 = vpop.xlane.xlu0 %467 }
 0x183   : > { %833 = vrcp.f32 %v560_v34  ;;  %v548_v49 = vmul.f32 1.442695, %v521_v35  ;;  %v507_v50 = vadd.f32 %v491_v29, %v471_v46  ;;  %v822_v51 = vpop.eup %821  ;;  %v506_v56 = vadd.f32 %v490_v47, %v468_v61 }
 0x184   : > { %v824_v54 = vpop.eup %823  ;;  %v562_v62 = vadd.f32 1.0, %v822_v51  ;;  %v546_v11 = vmul.f32 1.442695, %v520_v52 }
 0x185   : > { %835 = vpow2.f32 %v548_v49  ;;  %v523_v55 = vsub.f32 0.0, %v507_v50  ;;  %v563_v10 = vadd.f32 1.0, %v824_v54  ;;  %v522_v17 = vsub.f32 0.0, %v506_v56 }
 0x186   : > { %837 = vpow2.f32 %v540_v40  ;;  %v477_v58 = vpop.xlane.xlu1 %476  ;;  %v474_v60 = vpop.xlane.xlu0 %473 }
 0x187   : > { %839 = vrcp.f32 %v561_v48  ;;  %v552_v63 = vmul.f32 1.442695, %v523_v55  ;;  %v509_v3 = vadd.f32 %v493_v53, %v477_v58  ;;  %v508_v23 = vadd.f32 %v492_v59, %v474_v60 }
 0x188   : > { %v826_v7 = vpop.eup %825  ;;  %v550_v41 = vmul.f32 1.442695, %v522_v17 }
 0x189   : > { %v828_v16 = vpop.eup %827  ;;  %841 = vpow2.f32 %v552_v63  ;;  %v525_v22 = vsub.f32 0.0, %v509_v3  ;;  %597 = vperm.xlu1 %812, %v826_v7   ;;  %v524_v46 = vsub.f32 0.0, %v508_v23 }
 0x18a   : > { %843 = vpow2.f32 %v542_v57  ;;  %592 = vperm.xlu0 %811, %v828_v16  }
 0x18b   : > { %v830_v28 = vpop.eup %829  ;;  %845 = vrcp.f32 %v562_v62  ;;  %v556_v29 = vmul.f32 1.442695, %v525_v22  ;;  %v554_v51 = vmul.f32 1.442695, %v524_v46 }
 0x18c   : > { %v832_v34 = vpop.eup %831  ;;  %847 = vrcp.f32 %v563_v10  ;;  %v567_v35 = vadd.f32 1.0, %v830_v28 }
 0x18d   : > { %v834_v40 = vpop.eup %833  ;;  %849 = vpow2.f32 %v546_v11  ;;  %v564_v61 = vadd.f32 1.0, %v832_v34 }
 0x18e   : > { %851 = vrcp.f32 %v567_v35  ;;  %602 = vperm.xlu1 %812, %v834_v40  }
 0x18f   : > { %v836_v47 = vpop.eup %835  ;;  %853 = vpow2.f32 %v556_v29 }
 0x190   : > { %v838_v48 = vpop.eup %837  ;;  %v569_v49 = vadd.f32 1.0, %v836_v47  ;;  %855 = vpow2.f32 %v550_v41 }
 0x191   : > { %v840_v50 = vpop.eup %839  ;;  %v565_v53 = vadd.f32 1.0, %v838_v48 }
 0x192   : > { %857 = vrcp.f32 %v569_v49  ;;  %607 = vperm.xlu1 %812, %v840_v50  }
 0x193   : > { %v842_v52 = vpop.eup %841  ;;  %859 = vrcp.f32 %v564_v61 }
 0x194   : > { %v844_v54 = vpop.eup %843  ;;  %v571_v55 = vadd.f32 1.0, %v842_v52  ;;  %861 = vpow2.f32 %v554_v51 }
 0x195   : > { %v846_v56 = vpop.eup %845  ;;  %v566_v59 = vadd.f32 1.0, %v844_v54 }
 0x196   : > { %v848_v57 = vpop.eup %847  ;;  %863 = vrcp.f32 %v571_v55  ;;  %612 = vperm.xlu1 %812, %v846_v56  }
 0x197   : > { %v850_v58 = vpop.eup %849  ;;  %865 = vrcp.f32 %v565_v53 }
 0x198   : > { %v852_v60 = vpop.eup %851  ;;  %867 = vrcp.f32 %v566_v59  ;;  %v568_v7 = vadd.f32 1.0, %v850_v58 }
 0x199   : > { %v854_v62 = vpop.eup %853  ;;  %637 = vperm.xlu0 %811, %v852_v60  }
 0x19a   : > { %v573_v63 = vadd.f32 1.0, %v854_v62  ;;  %617 = vperm.xlu1 %812, %v848_v57   ;;  %v856_v3 = vpop.eup %855 }
 0x19b   : > { %v570_v17 = vadd.f32 1.0, %v856_v3 }
 0x19c   : > { %v858_v10 = vpop.eup %857  ;;  %869 = vrcp.f32 %v573_v63 }
 0x19d   : > { %v860_v11 = vpop.eup %859  ;;  %647 = vperm.xlu0 %811, %v858_v10   ;;  %871 = vrcp.f32 %v568_v7 }
 0x19e   : > { %622 = vperm.xlu1 %812, %v860_v11   ;;  %v862_v16 = vpop.eup %861  ;;  %873 = vrcp.f32 %v570_v17 }
 0x19f   : > { %v572_v28 = vadd.f32 1.0, %v862_v16 }
 0x1a0   : > { %v864_v22 = vpop.eup %863 }
 0x1a1   : > { %v866_v23 = vpop.eup %865  ;;  %657 = vperm.xlu0 %811, %v864_v22   ;;  %875 = vrcp.f32 %v572_v28 }
 0x1a2   : > { %627 = vperm.xlu1 %812, %v866_v23   ;;  %v868_v29 = vpop.eup %867 }
 0x1a6   : > { %v870_v34 = vpop.eup %869  ;;  %632 = vperm.xlu1 %812, %v868_v29  }
 0x1a7   : > { %667 = vperm.xlu0 %811, %v870_v34   ;;  %v872_v35 = vpop.eup %871 }
 0x1a8   : > { %v874_v40 = vpop.eup %873 }
 0x1aa   : > { %642 = vperm.xlu1 %812, %v872_v35  }
 0x1ab   : > { %v876_v41 = vpop.eup %875 }
 0x1ae   : > { %652 = vperm.xlu1 %812, %v874_v40  }
 0x1b2   : > { %662 = vperm.xlu1 %812, %v876_v41  }
 0x208   : > { %v598_v46 = vpop.permute.xlu1 %597 }
 0x209   : > { %v672_v47 = vmul.f32 %v598_v46, %v949_v5  ;;  %v673_v61 = vmul.f32 %v598_v46, %v952_v6  ;;  %v593_v48 = vpop.permute.xlu0 %592 }
 0x20a   : > { %v670_v49 = vmul.f32 %v593_v48, %v935_v0  ;;  %v671_v50 = vmul.f32 %v593_v48, %v938_v1 }
 0x20b   : > { %704 = vst [vmem:[%s1246_s11 + $0x10] sm:$0xff] %v672_v47  ;;  %705 = vst [vmem:[%s1246_s11 + $0x18] sm:$0xff] %v673_v61 }
 0x20c   : > { %702 = vst [vmem:[%s1246_s11] sm:$0xff] %v670_v49  ;;  %703 = vst [vmem:[%s1246_s11 + $0x8] sm:$0xff] %v671_v50 }
 0x20d   : > { %v603_v51 = vpop.permute.xlu1 %602 }
 0x20e   : > { %v674_v52 = vmul.f32 %v603_v51, %v941_v2  ;;  %v675_v5 = vmul.f32 %v603_v51, %v946_v4 }
 0x210   : > { %706 = vst [vmem:[%s1246_s11 + $0x20] sm:$0xff] %v674_v52  ;;  %707 = vst [vmem:[%s1246_s11 + $0x28] sm:$0xff] %v675_v5 }
 0x211   : > { %v608_v6 = vpop.permute.xlu1 %607 }
 0x212   : > { %v676_v53 = vmul.f32 %v608_v6, %v957_v8  ;;  %v677_v0 = vmul.f32 %v608_v6, %v960_v9 }
 0x214   : > { %708 = vst [vmem:[%s1246_s11 + $0x30] sm:$0xff] %v676_v53  ;;  %709 = vst [vmem:[%s1246_s11 + $0x38] sm:$0xff] %v677_v0 }
 0x215   : > { %v613_v1 = vpop.permute.xlu1 %612 }
 0x216   : > { %v678_v54 = vmul.f32 %v613_v1, %v967_v12  ;;  %v679_v2 = vmul.f32 %v613_v1, %v970_v13 }
 0x218   : > { %710 = vst [vmem:[%s1246_s11 + $0x40] sm:$0xff] %v678_v54  ;;  %711 = vst [vmem:[%s1246_s11 + $0x48] sm:$0xff] %v679_v2  ;;  %v638_v4 = vpop.permute.xlu0 %637 }
 0x219   : > { %v618_v55 = vpop.permute.xlu1 %617  ;;  %v688_v8 = vmul.f32 %v638_v4, %v1005_v26  ;;  %v689_v9 = vmul.f32 %v638_v4, %v1008_v27 }
 0x21a   : > { %v680_v56 = vmul.f32 %v618_v55, %v973_v14  ;;  %v681_v57 = vmul.f32 %v618_v55, %v976_v15 }
 0x21b   : > { %720 = vst [vmem:[%s1246_s11 + $0x90] sm:$0xff] %v688_v8  ;;  %721 = vst [vmem:[%s1246_s11 + $0x98] sm:$0xff] %v689_v9 }
 0x21c   : > { %712 = vst [vmem:[%s1246_s11 + $0x50] sm:$0xff] %v680_v56  ;;  %713 = vst [vmem:[%s1246_s11 + $0x58] sm:$0xff] %v681_v57  ;;  %v648_v12 = vpop.permute.xlu0 %647 }
 0x21d   : > { %v623_v13 = vpop.permute.xlu1 %622  ;;  %v692_v58 = vmul.f32 %v648_v12, %v1021_v32  ;;  %v693_v26 = vmul.f32 %v648_v12, %v1024_v33 }
 0x21e   : > { %v682_v27 = vmul.f32 %v623_v13, %v983_v18  ;;  %v683_v14 = vmul.f32 %v623_v13, %v986_v19 }
 0x21f   : > { %724 = vst [vmem:[%s1246_s11 + $0xb0] sm:$0xff] %v692_v58  ;;  %725 = vst [vmem:[%s1246_s11 + $0xb8] sm:$0xff] %v693_v26 }
 0x220   : > { %714 = vst [vmem:[%s1246_s11 + $0x60] sm:$0xff] %v682_v27  ;;  %715 = vst [vmem:[%s1246_s11 + $0x68] sm:$0xff] %v683_v14  ;;  %v658_v15 = vpop.permute.xlu0 %657 }
 0x221   : > { %v628_v59 = vpop.permute.xlu1 %627  ;;  %v696_v60 = vmul.f32 %v658_v15, %v1037_v38  ;;  %v697_v32 = vmul.f32 %v658_v15, %v1040_v39 }
 0x222   : > { %v684_v33 = vmul.f32 %v628_v59, %v989_v20  ;;  %v685_v18 = vmul.f32 %v628_v59, %v992_v21 }
 0x223   : > { %728 = vst [vmem:[%s1246_s11 + $0xd0] sm:$0xff] %v696_v60  ;;  %729 = vst [vmem:[%s1246_s11 + $0xd8] sm:$0xff] %v697_v32 }
 0x224   : > { %716 = vst [vmem:[%s1246_s11 + $0x70] sm:$0xff] %v684_v33  ;;  %717 = vst [vmem:[%s1246_s11 + $0x78] sm:$0xff] %v685_v18 }
 0x225   : > { %v633_v19 = vpop.permute.xlu1 %632 }
 0x226   : > { %v686_v62 = vmul.f32 %v633_v19, %v999_v24  ;;  %v687_v63 = vmul.f32 %v633_v19, %v1002_v25  ;;  %v668_v38 = vpop.permute.xlu0 %667 }
 0x227   : > { %v700_v39 = vmul.f32 %v668_v38, %v1053_v44  ;;  %v701_v20 = vmul.f32 %v668_v38, %v1056_v45 }
 0x228   : > { %718 = vst [vmem:[%s1246_s11 + $0x80] sm:$0xff] %v686_v62  ;;  %719 = vst [vmem:[%s1246_s11 + $0x88] sm:$0xff] %v687_v63 }
 0x229   : > { %732 = vst [vmem:[%s1246_s11 + $0xf0] sm:$0xff] %v700_v39  ;;  %733 = vst [vmem:[%s1246_s11 + $0xf8] sm:$0xff] %v701_v20  ;;  %v643_v21 = vpop.permute.xlu1 %642 }
 0x22a   : > { %v690_v3 = vmul.f32 %v643_v21, %v1015_v30  ;;  %v691_v24 = vmul.f32 %v643_v21, %v1018_v31 }
 0x22c   : > { %722 = vst [vmem:[%s1246_s11 + $0xa0] sm:$0xff] %v690_v3  ;;  %723 = vst [vmem:[%s1246_s11 + $0xa8] sm:$0xff] %v691_v24 }
 0x22d   : > { %v653_v25 = vpop.permute.xlu1 %652 }
 0x22e   : > { %v694_v7 = vmul.f32 %v653_v25, %v1031_v36  ;;  %v695_v44 = vmul.f32 %v653_v25, %v1034_v37 }
 0x230   : > { %726 = vst [vmem:[%s1246_s11 + $0xc0] sm:$0xff] %v694_v7  ;;  %727 = vst [vmem:[%s1246_s11 + $0xc8] sm:$0xff] %v695_v44 }
 0x231   : > { %v663_v45 = vpop.permute.xlu1 %662 }
 0x232   : > { %v698_v10 = vmul.f32 %v663_v45, %v1047_v42  ;;  %v699_v11 = vmul.f32 %v663_v45, %v1050_v43 }
 0x234   : > { %730 = vst [vmem:[%s1246_s11 + $0xe0] sm:$0xff] %v698_v10  ;;  %731 = vst [vmem:[%s1246_s11 + $0xe8] sm:$0xff] %v699_v11 }
 0x235 PF: > { %s15_s18 = sadd.s32 1, %s883_s18  }
 0x236   : > { %p12_p4 = scmp.ge.s32.totalorder %s15_s18, 4  }
 0x238   :  { %14 = sbr.rel (!%p12_p4) target bundleno = 1 (0x1), region = 70 }

</bundles_post_ra>
